<compile_context>
chip_gen: v5e
topology: v5e:2x2
jax: 0.10.0
libtpu: 0.0.40
codegen_flags: <defaults>
</compile_context>

<pallas_src>
import jax
import jax.numpy as jnp
from jax import lax
from jax.experimental import pallas as pl
from jax.experimental.pallas import tpu as pltpu


def _round_up(x: int, m: int) -> int:
    return ((x + m - 1) // m) * m


def _ste_softmax_kernel(s_ref, z_ref):
    """One batch tile: z = one_hot(argmax(s, axis=-1)), first index on ties."""
    s = s_ref[...]                                            # (TB, K)
    K = s.shape[-1]
    m = jnp.max(s, axis=-1, keepdims=True)                    # (TB, 1) row max
    iota_k = lax.broadcasted_iota(jnp.int32, s.shape, 1)      # (TB, K)
    cand = jnp.where(s == m, iota_k, jnp.int32(K))            # mask non-max lanes
    idx = jnp.min(cand, axis=-1, keepdims=True)               # first-max index (torch tie-break)
    z_ref[...] = (iota_k == idx).astype(z_ref.dtype)          # hard one-hot


def ste_softmax_pallas(s, *, block_rows: int = 512):
    """Batch-tiled STE-softmax forward: one grid step per row tile."""
    B, K = s.shape
    tb = min(block_rows, _round_up(B, 8))      # sublane-aligned tile height
    b_pad = _round_up(B, tb)
    s_p = jnp.pad(s, ((0, b_pad - B), (0, 0))) if b_pad != B else s

    z = pl.pallas_call(
        _ste_softmax_kernel,
        out_shape=jax.ShapeDtypeStruct((b_pad, K), s.dtype),
        grid_spec=pltpu.PrefetchScalarGridSpec(
            num_scalar_prefetch=0,
            grid=(b_pad // tb,),
            in_specs=[pl.BlockSpec((tb, K), lambda i: (i, 0))],
            out_specs=pl.BlockSpec((tb, K), lambda i: (i, 0)),
        ),
        compiler_params=pltpu.CompilerParams(
            dimension_semantics=("parallel",),   # v7x: shard batch tiles across both TCs
        ),
    )(s_p)
    return z[:B] if b_pad != B else z


def latent_ste_softmax_forward(s, decoder=None, X=None, y=None, *, block_rows: int = 512):
    """Mirrors LatentSTESoftmax.forward(s, decoder, X, y): only `s` is used."""
    del decoder, X, y  # unused in the module's forward (training-time STE only)
    return ste_softmax_pallas(s, block_rows=block_rows)


def ste_softmax_reference(s):
    """Pure-JAX reference of the same forward semantics."""
    p = jax.nn.softmax(s, axis=-1)
    idx = jnp.argmax(p, axis=-1)               # same argmax as argmax(s)
    return jax.nn.one_hot(idx, s.shape[-1], dtype=s.dtype)


if __name__ == "__main__":
    key = jax.random.PRNGKey(0)
    k_s, k_x, k_y, k_s2 = jax.random.split(key, 4)

    # Small shapes consistent with the latent-classification module:
    # B examples, K latent categories, D decoder-input features, C classes.
    B, K, D, C = 8, 4, 32, 8
    s = jax.random.normal(k_s, (B, K), dtype=jnp.float32)       # latent scores
    X = jax.random.normal(k_x, (B, D), dtype=jnp.float32)       # unused by forward
    y = jax.random.randint(k_y, (B,), 0, C, dtype=jnp.int32)    # unused by forward

    z = jax.block_until_ready(latent_ste_softmax_forward(s, None, X, y))
    ref = ste_softmax_reference(s)
    assert z.shape == (B, K), z.shape
    assert jnp.all(jnp.isfinite(z)), "z is not finite"
    assert jnp.all(jnp.sum(z, axis=-1) == 1.0), "z rows are not one-hot"
    assert jnp.array_equal(z, ref), (z, ref)

    # Larger batch exercises the batch-tiled grid (multiple pipelined tiles).
    B2, K2 = 2048, 16
    s2 = jax.random.normal(k_s2, (B2, K2), dtype=jnp.float32)
    z2 = jax.block_until_ready(ste_softmax_pallas(s2, block_rows=512))
    assert jnp.array_equal(z2, ste_softmax_reference(s2))

    print("KERNEL_OK")
</pallas_src>

<mosaic_0001>
module attributes {stable_mosaic.version = 11 : i64} {
  func.func @_ste_softmax_kernel(%arg0: i32, %arg1: memref<8x4xf32, #tpu.memory_space<vmem>>, %arg2: memref<8x4xf32, #tpu.memory_space<vmem>>) attributes {dimension_semantics = [#tpu.dimension_semantics<parallel>], iteration_bounds = array<i64: 1>, scalar_prefetch = 0 : i64, scratch_operands = 0 : i64, tpu.core_type = #tpu.core_type<tc>, window_params = [{transform_indices = @transform_0, window_bounds = array<i64: 8, 4>}, {transform_indices = @transform_1, window_bounds = array<i64: 8, 4>}]} {
    %c0 = arith.constant 0 : index
    %c0_0 = arith.constant 0 : index
    %0 = vector.load %arg1[%c0, %c0_0] : memref<8x4xf32, #tpu.memory_space<vmem>>, vector<8x4xf32>
    %cst = arith.constant dense<0xFF800000> : vector<8xf32>
    %1 = vector.multi_reduction <maximumf>, %0, %cst [1] : vector<8x4xf32> to vector<8xf32>
    %2 = vector.shape_cast %1 : vector<8xf32> to vector<8x1xf32>
    %3 = tpu.iota {dimensions = array<i32: 1>} : vector<8x4xi32>
    %4 = vector.broadcast %2 : vector<8x1xf32> to vector<8x4xf32>
    %5 = arith.cmpf oeq, %0, %4 : vector<8x4xf32>
    %c4_i32 = arith.constant 4 : i32
    %6 = vector.broadcast %c4_i32 : i32 to vector<8x4xi32>
    %7 = arith.select %5, %3, %6 : vector<8x4xi1>, vector<8x4xi32>
    %cst_1 = arith.constant dense<2147483647> : vector<8xi32>
    %8 = vector.multi_reduction <minsi>, %7, %cst_1 [1] : vector<8x4xi32> to vector<8xi32>
    %9 = vector.shape_cast %8 : vector<8xi32> to vector<8x1xi32>
    %10 = vector.broadcast %9 : vector<8x1xi32> to vector<8x4xi32>
    %11 = arith.cmpi eq, %3, %10 : vector<8x4xi32>
    %12 = arith.extui %11 : vector<8x4xi1> to vector<8x4xi32>
    %13 = arith.sitofp %12 : vector<8x4xi32> to vector<8x4xf32>
    %c0_2 = arith.constant 0 : index
    %c0_3 = arith.constant 0 : index
    %14 = vector.load %arg2[%c0_2, %c0_3] : memref<8x4xf32, #tpu.memory_space<vmem>>, vector<8x4xf32>
    tpu.vector_store %arg2[%c0_2, %c0_3], %13 {strides = array<i32>} : memref<8x4xf32, #tpu.memory_space<vmem>>, vector<8x4xf32>,
    return
  }
  func.func @transform_0(%arg0: i32) -> (i32, i32) {
    %c0_i32 = arith.constant 0 : i32
    %c0_i32_0 = arith.constant 0 : i32
    return %arg0, %c0_i32 : i32, i32
  }
  func.func @transform_1(%arg0: i32) -> (i32, i32) {
    %c0_i32 = arith.constant 0 : i32
    %c0_i32_0 = arith.constant 0 : i32
    return %arg0, %c0_i32 : i32, i32
  }
}

</mosaic_0001>

<bundles_post_ra>
// kernel: tpu_custom_call.1
= control target key start
LH: loop header
LB: loop body
LE: loop exit
PB: predicated region body
PF: predicated region fallthrough
CT: control target
= control target key end

     0   :  { %vm9_vm0 = vcmask 31744   ;;  %v13_v2 = vlaneseq  ;;  %v42_v18 = vmov 0.0   ;;  %s62_s0 = inlined_call_operand.vmem [shape: f32[8,4], index: 0, kind: input, shape index: {}]   ;;  %s63_s1 = inlined_call_operand.vmem [shape: f32[8,4], index: 1, kind: output, shape index: {}]  }
   0x1   :  { %v8_v0 = vld [vmem:[%s62_s0] sm:$0xff] }
   0x2   :  { %v10_v1 = vsel %vm9_vm0, %v8_v0, -inf  ;;  %v14_v3 = vand.u32 127, %v13_v2 }
   0x3   :  { %11 = vmax.xlane.f32.xlu0 %v10_v1 }
  0x76   :  { %v12_v4 = vpop.xlane.xlu0 %11 }
  0x77   :  { %vm15_vm1 = vcmp.eq.f32.partialorder %v8_v0, %v12_v4 }
  0x78   :  { %v16_v5 = vsel %vm15_vm1, %v14_v3, 4 }
  0x79   :  { %v17_v6 = vsel %vm9_vm0, %v16_v5, 2147483647 }
  0x7a   :  { %v19_v7 = vshra.s32 %v17_v6, 16  ;;  %v18_v9 = vand.u32 65535, %v17_v6 }
  0x7c   :  { %v21_v8 = vcvt.s32.f32 %v19_v7  ;;  %v20_v11 = vcvt.s32.f32 %v18_v9 }
  0x7e   :  { %22 = vmin.xlane.f32.xlu0 %v21_v8 }
  0xf1   :  { %v23_v10 = vpop.xlane.xlu0 %22 }
  0xf2   :  { %vm24_vm2 = vcmp.eq.f32.partialorder %v21_v8, %v23_v10  ;;  %v29_v13 = vcvt.f32.s32 %v23_v10 }
  0xf3   :  { %v25_v12 = vsel %vm24_vm2, %v20_v11, inf }
  0xf4   :  { %26 = vmin.xlane.f32.xlu1 %v25_v12  ;;  %v30_v15 = vshll.u32 %v29_v13, 16 }
 0x167   :  { %v27_v14 = vpop.xlane.xlu1 %26 }
 0x168   :  { %v28_v16 = vcvt.f32.s32 %v27_v14 }
 0x16a   :  { %v31_v17 = vadd.s32 %v30_v15, %v28_v16 }
 0x16c   :  { %vm32_vm3 = vcmp.eq.s32.totalorder %v14_v3, %v31_v17 }
 0x16d   :  { %v40_v19 = vsel %vm32_vm3, 1.0, %v42_v18 }
 0x16e   :  { %35 = vst.msk [vmem:[%s63_s1] sm:$0xff] %vm9_vm0, %v40_v19 }

</bundles_post_ra>
